<compile_context>
chip_gen: v5e
topology: v5e:2x2
jax: 0.10.0
libtpu: 0.0.40
codegen_flags: <defaults>
</compile_context>

<pallas_src>
import jax
import jax.numpy as jnp
from jax.experimental import pallas as pl
from jax.experimental.pallas import tpu as pltpu


def _round_up(x, m):
    return (x + m - 1) // m * m


def _make_proj_kernel(tv, vocab, nv, cached):
    """Kernel body factory.

    Grid = (nm, 2, nv):
      p = program_id(1): 0 -> matmul + online softmax stats (+ logits cache),
                         1 -> normalize & write.
      j = program_id(2): vocab tile index.
    """
    ragged = (nv * tv != vocab)
    neg_big = -1e30  # padded-column fill; never wins the max, exp() underflows to 0

    def kernel(x_ref, w_ref, b_ref, o_ref, *scratch):
        if cached:
            cache_ref, m_scr, l_scr, lse_scr = scratch
        else:
            m_scr, l_scr, lse_scr = scratch

        p = pl.program_id(1)
        j = pl.program_id(2)

        @pl.when((p == 0) & (j == 0))
        def _init():
            m_scr[...] = jnp.full(m_scr.shape, -jnp.inf, m_scr.dtype)
            l_scr[...] = jnp.zeros(l_scr.shape, l_scr.dtype)

        def compute_logits():
            # MXU matmul: bf16 operands, f32 accumulation; bias add in f32.
            logits = jnp.dot(x_ref[...], w_ref[...],
                             preferred_element_type=jnp.float32)
            logits = logits + b_ref[...]
            if ragged:
                # Mask out-of-vocab columns of the (padded) last vocab tile so
                # garbage weight/bias columns cannot perturb the softmax.
                col = j * tv + jax.lax.broadcasted_iota(jnp.int32, logits.shape, 1)
                logits = jnp.where(col < vocab, logits, neg_big)
            return logits

        @pl.when(p == 0)
        def _reduce():
            logits = compute_logits()
            m_prev = m_scr[...]
            m_new = jnp.maximum(m_prev, jnp.max(logits, axis=-1, keepdims=True))
            l_scr[...] = (l_scr[...] * jnp.exp(m_prev - m_new)
                          + jnp.sum(jnp.exp(logits - m_new), axis=-1, keepdims=True))
            m_scr[...] = m_new
            if cached:
                cache_ref[j] = logits

        @pl.when((p == 1) & (j == 0))
        def _hoist_lse():
            lse_scr[...] = m_scr[...] + jnp.log(l_scr[...])

        @pl.when(p == 1)
        def _write():
            if cached:
                logits = cache_ref[j]
            else:
                logits = compute_logits()   # fallback: recompute (second matmul)
            o_ref[...] = (logits - lse_scr[...]).astype(o_ref.dtype)

    return kernel


def projection_layer(x, w, b, *, tm=512, tv=512,
                     compute_dtype=jnp.bfloat16, out_dtype=None):
    """log_softmax(x @ w + b, axis=-1).

    x: (batch, seq, d_model); w: (d_model, vocab); b: (vocab,).
    Returns (batch, seq, vocab) in `out_dtype` (default: x.dtype).
    Tip: persist `w` in `compute_dtype` (bf16) to avoid a per-call cast copy.
    """
    batch, seq, d_model = x.shape
    vocab = w.shape[1]
    M = batch * seq
    out_dtype = out_dtype or x.dtype

    in_b = jnp.dtype(compute_dtype).itemsize
    out_b = jnp.dtype(out_dtype).itemsize

    # Generation-aware VMEM budget (leave ~15% headroom for compiler scratch).
    try:
        vmem_cap = int(pltpu.get_tpu_info().vmem_capacity_bytes)
    except Exception:
        vmem_cap = 64 * 2 ** 20   # conservative (v7x-sized) fallback
    budget = int(vmem_cap * 0.85)

    # Tile sizes: clamp to the (padded) problem, keep (8, 128) alignment.
    tm = min(tm, _round_up(M, 8))
    tv = min(tv, _round_up(vocab, 128))

    def base_bytes(tm_, tv_):
        # Double-buffered x / w / bias / out tiles plus the tiny (tm,1) scratches.
        return (2 * tm_ * d_model * in_b
                + 2 * d_model * tv_ * in_b
                + 2 * 8 * tv_ * 4
                + 2 * tm_ * tv_ * out_b
                + 3 * tm_ * 128 * 4)

    # Shrink tiles if even the base working set exceeds the budget (huge d_model).
    while tm > 64 and base_bytes(tm, tv) > budget:
        tm = max(8, _round_up(tm // 2, 8))
    while tv > 128 and base_bytes(tm, tv) > budget:
        tv = max(128, _round_up(tv // 2, 128))

    Mp = _round_up(M, tm)
    nm = Mp // tm
    nv = -(-vocab // tv)
    Vp = nv * tv

    # Prefer the single-matmul variant: cache the f32 logits row stripe in VMEM.
    cache_bytes = nv * tm * tv * 4
    use_cache = base_bytes(tm, tv) + cache_bytes <= budget
    need = base_bytes(tm, tv) + (cache_bytes if use_cache else 0)
    vmem_limit = int(min(budget, max(32 * 2 ** 20, int(1.3 * need))))

    # Operand prep.  No weight padding copy: the ragged last vocab tile is masked
    # in-kernel.  The x row pad (<= tm-1 rows) is cheap.
    x2 = x.reshape(M, d_model)
    if x2.dtype != compute_dtype:
        x2 = x2.astype(compute_dtype)
    if Mp != M:
        x2 = jnp.pad(x2, ((0, Mp - M), (0, 0)))
    w2 = w if w.dtype == compute_dtype else w.astype(compute_dtype)
    b2 = b.reshape(1, vocab).astype(jnp.float32)

    # Weight / bias column index: in the cached variant, pin to the last fetched
    # block during the write pass so no extra DMA is issued (W streamed exactly
    # once per row tile).
    if use_cache:
        def col_idx(p, j):
            return j * (1 - p) + (nv - 1) * p
    else:
        def col_idx(p, j):
            return j

    in_specs = [
        pl.BlockSpec((tm, d_model), lambda i, p, j: (i, 0)),
        pl.BlockSpec((d_model, tv), lambda i, p, j: (0, col_idx(p, j))),
        pl.BlockSpec((1, tv), lambda i, p, j: (0, col_idx(p, j))),
    ]
    # Output block stays parked at (i, 0) during the reduction pass and is written
    # exactly once per vocab tile during the write pass (p=1); no revisits.
    out_specs = pl.BlockSpec((tm, tv), lambda i, p, j: (i, j * p))

    scratch_shapes = [
        pltpu.VMEM((tm, 1), jnp.float32),   # running max
        pltpu.VMEM((tm, 1), jnp.float32),   # running sum-exp
        pltpu.VMEM((tm, 1), jnp.float32),   # hoisted logsumexp
    ]
    if use_cache:
        scratch_shapes = [pltpu.VMEM((nv, tm, tv), jnp.float32)] + scratch_shapes

    matmul_passes = 1 if use_cache else 2
    cost = pl.CostEstimate(
        flops=2 * Mp * d_model * Vp * matmul_passes,
        transcendentals=Mp * Vp,
        bytes_accessed=(Mp * d_model * in_b
                        + nm * d_model * vocab * in_b * matmul_passes
                        + Mp * vocab * out_b),
    )

    out = pl.pallas_call(
        _make_proj_kernel(tv, vocab, nv, use_cache),
        out_shape=jax.ShapeDtypeStruct((Mp, vocab), out_dtype),
        grid_spec=pltpu.PrefetchScalarGridSpec(
            num_scalar_prefetch=0,
            grid=(nm, 2, nv),
            in_specs=in_specs,
            out_specs=out_specs,
            scratch_shapes=scratch_shapes,
        ),
        compiler_params=pltpu.CompilerParams(
            dimension_semantics=("parallel", "arbitrary", "arbitrary"),
            vmem_limit_bytes=vmem_limit,
        ),
        cost_estimate=cost,
    )(x2, w2, b2)

    return out[:M].reshape(batch, seq, vocab)


if __name__ == "__main__":
    # Small shapes implied by the forward: (batch, seq, d_model) -> (batch, seq, vocab)
    batch, seq, d_model, vocab = 2, 8, 32, 128

    key = jax.random.PRNGKey(0)
    kx, kw, kb = jax.random.split(key, 3)

    # Deterministic init mimicking nn.Linear's U(-1/sqrt(d_model), 1/sqrt(d_model)).
    bound = 1.0 / (d_model ** 0.5)
    w = jax.random.uniform(kw, (d_model, vocab), jnp.float32, -bound, bound)
    b = jax.random.uniform(kb, (vocab,), jnp.float32, -bound, bound)
    x = jax.random.normal(kx, (batch, seq, d_model), jnp.float32)

    out = jax.block_until_ready(projection_layer(x, w, b))
    assert out.shape == (batch, seq, vocab)

    # Reference with the same bf16 matmul operands (f32 accumulate) — tight tolerance.
    logits_ref = jnp.dot(x.reshape(-1, d_model).astype(jnp.bfloat16),
                         w.astype(jnp.bfloat16),
                         preferred_element_type=jnp.float32) + b
    ref = jax.nn.log_softmax(logits_ref, axis=-1).reshape(batch, seq, vocab)
    assert jnp.allclose(out, ref, atol=2e-3, rtol=2e-3), float(jnp.max(jnp.abs(out - ref)))

    # Loose sanity check vs the full-f32 PyTorch-equivalent reference (bf16 rounding).
    ref_f32 = jax.nn.log_softmax(x @ w + b, axis=-1)
    assert jnp.allclose(out, ref_f32, atol=1e-1, rtol=1e-1)

    print("KERNEL_OK")
</pallas_src>

<mosaic_0001>
module attributes {stable_mosaic.version = 11 : i64} {
  func.func @kernel(%arg0: i32, %arg1: i32, %arg2: i32, %arg3: memref<16x32xbf16, #tpu.memory_space<vmem>>, %arg4: memref<32x128xbf16, #tpu.memory_space<vmem>>, %arg5: memref<1x128xf32, #tpu.memory_space<vmem>>, %arg6: memref<16x128xf32, #tpu.memory_space<vmem>>, %arg7: memref<1x16x128xf32, #tpu.memory_space<vmem>>, %arg8: memref<16x1xf32, #tpu.memory_space<vmem>>, %arg9: memref<16x1xf32, #tpu.memory_space<vmem>>, %arg10: memref<16x1xf32, #tpu.memory_space<vmem>>) attributes {dimension_semantics = [#tpu.dimension_semantics<parallel>, #tpu.dimension_semantics<arbitrary>, #tpu.dimension_semantics<arbitrary>], iteration_bounds = array<i64: 1, 2, 1>, scalar_prefetch = 0 : i64, scratch_operands = 4 : i64, tpu.core_type = #tpu.core_type<tc>, window_params = [{transform_indices = @transform_0, window_bounds = array<i64: 16, 32>}, {transform_indices = @transform_1, window_bounds = array<i64: 32, 128>}, {transform_indices = @transform_2, window_bounds = array<i64: 1, 128>}, {transform_indices = @transform_3, window_bounds = array<i64: 16, 128>}]} {
    %c0_i32 = arith.constant 0 : i32
    %0 = arith.cmpi eq, %arg1, %c0_i32 : i32
    %c0_i32_0 = arith.constant 0 : i32
    %1 = arith.cmpi eq, %arg2, %c0_i32_0 : i32
    %2 = arith.andi %0, %1 : i1
    %3 = arith.extui %2 : i1 to i32
    %c0_i32_1 = arith.constant 0 : i32
    %4 = arith.cmpi ne, %3, %c0_i32_1 : i32
    scf.if %4 {
      %cst = arith.constant 0xFF800000 : f32
      %16 = vector.broadcast %cst : f32 to vector<16x1xf32>
      %c0 = arith.constant 0 : index
      %c0_8 = arith.constant 0 : index
      %17 = vector.load %arg8[%c0, %c0_8] : memref<16x1xf32, #tpu.memory_space<vmem>>, vector<16x1xf32>
      tpu.vector_store %arg8[%c0, %c0_8], %16 {strides = array<i32>} : memref<16x1xf32, #tpu.memory_space<vmem>>, vector<16x1xf32>,
      %cst_9 = arith.constant 0.000000e+00 : f32
      %18 = vector.broadcast %cst_9 : f32 to vector<16x1xf32>
      %c0_10 = arith.constant 0 : index
      %c0_11 = arith.constant 0 : index
      %19 = vector.load %arg9[%c0_10, %c0_11] : memref<16x1xf32, #tpu.memory_space<vmem>>, vector<16x1xf32>
      tpu.vector_store %arg9[%c0_10, %c0_11], %18 {strides = array<i32>} : memref<16x1xf32, #tpu.memory_space<vmem>>, vector<16x1xf32>,
    } else {
    }
    %c0_i32_2 = arith.constant 0 : i32
    %5 = arith.cmpi eq, %arg1, %c0_i32_2 : i32
    %6 = arith.extui %5 : i1 to i32
    %c0_i32_3 = arith.constant 0 : i32
    %7 = arith.cmpi ne, %6, %c0_i32_3 : i32
    scf.if %7 {
      %c0 = arith.constant 0 : index
      %c0_8 = arith.constant 0 : index
      %16 = vector.load %arg3[%c0, %c0_8] : memref<16x32xbf16, #tpu.memory_space<vmem>>, vector<16x32xbf16>
      %c0_9 = arith.constant 0 : index
      %c0_10 = arith.constant 0 : index
      %17 = vector.load %arg4[%c0_9, %c0_10] : memref<32x128xbf16, #tpu.memory_space<vmem>>, vector<32x128xbf16>
      %cst = arith.constant dense<0.000000e+00> : vector<16x128xf32>
      %18 = tpu.matmul %16, %17, %cst {dimension_numbers = #tpu.dot_dimension_numbers<[1], [0], [0], [1], [0, 0, 1, 1], [], []>} : vector<16x32xbf16>, vector<32x128xbf16>, vector<16x128xf32> -> vector<16x128xf32>
      %c0_11 = arith.constant 0 : index
      %c0_12 = arith.constant 0 : index
      %19 = vector.load %arg5[%c0_11, %c0_12] : memref<1x128xf32, #tpu.memory_space<vmem>>, vector<1x128xf32>
      %20 = vector.broadcast %19 : vector<1x128xf32> to vector<16x128xf32>
      %21 = arith.addf %18, %20 : vector<16x128xf32>
      %c0_13 = arith.constant 0 : index
      %c0_14 = arith.constant 0 : index
      %22 = vector.load %arg8[%c0_13, %c0_14] : memref<16x1xf32, #tpu.memory_space<vmem>>, vector<16x1xf32>
      %cst_15 = arith.constant dense<0xFF800000> : vector<16xf32>
      %23 = vector.multi_reduction <maximumf>, %21, %cst_15 [1] : vector<16x128xf32> to vector<16xf32>
      %24 = vector.shape_cast %23 : vector<16xf32> to vector<16x1xf32>
      %25 = arith.maximumf %22, %24 : vector<16x1xf32>
      %c0_16 = arith.constant 0 : index
      %c0_17 = arith.constant 0 : index
      %26 = vector.load %arg9[%c0_16, %c0_17] : memref<16x1xf32, #tpu.memory_space<vmem>>, vector<16x1xf32>
      %27 = arith.subf %22, %25 : vector<16x1xf32>
      %28 = math.exp %27 : vector<16x1xf32>
      %29 = arith.mulf %26, %28 : vector<16x1xf32>
      %30 = vector.broadcast %25 : vector<16x1xf32> to vector<16x128xf32>
      %31 = arith.subf %21, %30 : vector<16x128xf32>
      %32 = math.exp %31 : vector<16x128xf32>
      %cst_18 = arith.constant dense<0.000000e+00> : vector<16xf32>
      %33 = vector.multi_reduction <add>, %32, %cst_18 [1] : vector<16x128xf32> to vector<16xf32>
      %34 = vector.shape_cast %33 : vector<16xf32> to vector<16x1xf32>
      %35 = arith.addf %29, %34 : vector<16x1xf32>
      %c0_19 = arith.constant 0 : index
      %c0_20 = arith.constant 0 : index
      %36 = vector.load %arg9[%c0_19, %c0_20] : memref<16x1xf32, #tpu.memory_space<vmem>>, vector<16x1xf32>
      tpu.vector_store %arg9[%c0_19, %c0_20], %35 {strides = array<i32>} : memref<16x1xf32, #tpu.memory_space<vmem>>, vector<16x1xf32>,
      %c0_21 = arith.constant 0 : index
      %c0_22 = arith.constant 0 : index
      %37 = vector.load %arg8[%c0_21, %c0_22] : memref<16x1xf32, #tpu.memory_space<vmem>>, vector<16x1xf32>
      tpu.vector_store %arg8[%c0_21, %c0_22], %25 {strides = array<i32>} : memref<16x1xf32, #tpu.memory_space<vmem>>, vector<16x1xf32>,
      %38 = arith.index_cast %arg2 : i32 to index
      %c0_23 = arith.constant 0 : index
      %c0_24 = arith.constant 0 : index
      %39 = vector.load %arg7[%38, %c0_23, %c0_24] : memref<1x16x128xf32, #tpu.memory_space<vmem>>, vector<1x16x128xf32>
      %40 = vector.shape_cast %39 : vector<1x16x128xf32> to vector<16x128xf32>
      %41 = vector.shape_cast %21 : vector<16x128xf32> to vector<1x16x128xf32>
      tpu.vector_store %arg7[%38, %c0_23, %c0_24], %41 {strides = array<i32>} : memref<1x16x128xf32, #tpu.memory_space<vmem>>, vector<1x16x128xf32>,
    } else {
    }
    %c1_i32 = arith.constant 1 : i32
    %8 = arith.cmpi eq, %arg1, %c1_i32 : i32
    %c0_i32_4 = arith.constant 0 : i32
    %9 = arith.cmpi eq, %arg2, %c0_i32_4 : i32
    %10 = arith.andi %8, %9 : i1
    %11 = arith.extui %10 : i1 to i32
    %c0_i32_5 = arith.constant 0 : i32
    %12 = arith.cmpi ne, %11, %c0_i32_5 : i32
    scf.if %12 {
      %c0 = arith.constant 0 : index
      %c0_8 = arith.constant 0 : index
      %16 = vector.load %arg8[%c0, %c0_8] : memref<16x1xf32, #tpu.memory_space<vmem>>, vector<16x1xf32>
      %c0_9 = arith.constant 0 : index
      %c0_10 = arith.constant 0 : index
      %17 = vector.load %arg9[%c0_9, %c0_10] : memref<16x1xf32, #tpu.memory_space<vmem>>, vector<16x1xf32>
      %18 = math.log %17 : vector<16x1xf32>
      %19 = arith.addf %16, %18 : vector<16x1xf32>
      %c0_11 = arith.constant 0 : index
      %c0_12 = arith.constant 0 : index
      %20 = vector.load %arg10[%c0_11, %c0_12] : memref<16x1xf32, #tpu.memory_space<vmem>>, vector<16x1xf32>
      tpu.vector_store %arg10[%c0_11, %c0_12], %19 {strides = array<i32>} : memref<16x1xf32, #tpu.memory_space<vmem>>, vector<16x1xf32>,
    } else {
    }
    %c1_i32_6 = arith.constant 1 : i32
    %13 = arith.cmpi eq, %arg1, %c1_i32_6 : i32
    %14 = arith.extui %13 : i1 to i32
    %c0_i32_7 = arith.constant 0 : i32
    %15 = arith.cmpi ne, %14, %c0_i32_7 : i32
    scf.if %15 {
      %16 = arith.index_cast %arg2 : i32 to index
      %c0 = arith.constant 0 : index
      %c0_8 = arith.constant 0 : index
      %17 = vector.load %arg7[%16, %c0, %c0_8] : memref<1x16x128xf32, #tpu.memory_space<vmem>>, vector<1x16x128xf32>
      %18 = vector.shape_cast %17 : vector<1x16x128xf32> to vector<16x128xf32>
      %c0_9 = arith.constant 0 : index
      %c0_10 = arith.constant 0 : index
      %19 = vector.load %arg10[%c0_9, %c0_10] : memref<16x1xf32, #tpu.memory_space<vmem>>, vector<16x1xf32>
      %20 = vector.broadcast %19 : vector<16x1xf32> to vector<16x128xf32>
      %21 = arith.subf %18, %20 : vector<16x128xf32>
      %c0_11 = arith.constant 0 : index
      %c0_12 = arith.constant 0 : index
      %22 = vector.load %arg6[%c0_11, %c0_12] : memref<16x128xf32, #tpu.memory_space<vmem>>, vector<16x128xf32>
      tpu.vector_store %arg6[%c0_11, %c0_12], %21 {strides = array<i32>} : memref<16x128xf32, #tpu.memory_space<vmem>>, vector<16x128xf32>,
    } else {
    }
    return
  }
  func.func @transform_0(%arg0: i32, %arg1: i32, %arg2: i32) -> (i32, i32) {
    %c0_i32 = arith.constant 0 : i32
    %c0_i32_0 = arith.constant 0 : i32
    return %arg0, %c0_i32 : i32, i32
  }
  func.func @transform_1(%arg0: i32, %arg1: i32, %arg2: i32) -> (i32, i32) {
    %c1_i32 = arith.constant 1 : i32
    %0 = arith.subi %c1_i32, %arg1 : i32
    %1 = arith.muli %arg2, %0 : i32
    %c0_i32 = arith.constant 0 : i32
    %2 = arith.muli %c0_i32, %arg1 : i32
    %3 = arith.addi %1, %2 : i32
    %c0_i32_0 = arith.constant 0 : i32
    %c0_i32_1 = arith.constant 0 : i32
    return %c0_i32_0, %3 : i32, i32
  }
  func.func @transform_2(%arg0: i32, %arg1: i32, %arg2: i32) -> (i32, i32) {
    %c1_i32 = arith.constant 1 : i32
    %0 = arith.subi %c1_i32, %arg1 : i32
    %1 = arith.muli %arg2, %0 : i32
    %c0_i32 = arith.constant 0 : i32
    %2 = arith.muli %c0_i32, %arg1 : i32
    %3 = arith.addi %1, %2 : i32
    %c0_i32_0 = arith.constant 0 : i32
    %c0_i32_1 = arith.constant 0 : i32
    return %c0_i32_0, %3 : i32, i32
  }
  func.func @transform_3(%arg0: i32, %arg1: i32, %arg2: i32) -> (i32, i32) {
    %0 = arith.muli %arg2, %arg1 : i32
    %c0_i32 = arith.constant 0 : i32
    return %arg0, %0 : i32, i32
  }
}

</mosaic_0001>

<bundles_post_ra>
// kernel: tpu_custom_call.1
= control target key start
LH: loop header
LB: loop body
LE: loop exit
PB: predicated region body
PF: predicated region fallthrough
CT: control target
= control target key end

     0   :  { %8 = vsyncpa [#allocation7], 0  ;;  %s916_s0 = inlined_call_operand.hbm [shape: bf16[16,32], index: 0, kind: input, shape index: {}]   ;;  %s917_s1 = inlined_call_operand.hbm [shape: bf16[32,128], index: 1, kind: input, shape index: {}]   ;;  %s918_s2 = inlined_call_operand.vmem [shape: f32[1,128], index: 2, kind: input, shape index: {}]   ;;  %s919_s3 = inlined_call_operand.hbm [shape: f32[16,128], index: 3, kind: output, shape index: {}]  }
   0x1   :  { %9 = vsyncpa [#allocation10], 0 }
   0x2   :  { %11 = vsyncpa [#allocation10 + $0x1], 0 }
   0x3   :  { %12 = vsyncpa [#allocation8], 0 }
   0x4   :  { %14 = vsyncpa [#allocation8 + $0x1], 0  ;;  %s832_s12 = smov 0   ;;  %s834_s13 = smov 0  }
   0x5   :  { %s836_s14 = smov 0  }
   0x6 LB: > { %s558_s15 = sadd.s32 4294967295, %s799_s14   ;;  %s559_s16 = sadd.s32 4294967294, %s799_s14   ;;  %s799_s14 = sphi %s836_s14, %s20_s14   ;;  %s795_s13 = sphi %s834_s13, %s923_s13   ;;  %s791_s12 = sphi %s832_s12, %s922_s12  }
   0x7   : > { %s35_s17 = sadd.s32 1, %s795_s13  ;;  %p560_p0 = scmp.ge.s32.totalorder %s799_s14, 1 }
   0x8   : > { %p37_p1 = scmp.ge.s32.totalorder %s35_s17, 2  ;;  %p160_p2 = scmp.lt.s32.totalorder %s799_s14, 3 }
   0x9   : > { %p854_p3 = scmp.eq.s32.totalorder %s558_s15, 0  ;;  %s174_s22 = sshll.u32 %s916_s0, 4  ;;  %s175_s22 = int_to_ptr.hbm [resolvable:$true] %s174_s22 }
   0xa   : > { %s925_s17 = smov (%p37_p1, %s35_s17), 0  ;;  %p860_p4 = pnand %p560_p0, %p160_p2 }
   0xb   : > { %s801_s23 = smov [#allocation6]   ;;  %p562_p7 = scmp.ge.s32.totalorder %s799_s14, 2 }
   0xc   : > { %p606_p5 = pneg %p860_p4  ;;  %s176_s24 = sshll.u32 %s801_s23, 4  ;;  %s177_s24 = int_to_ptr.vmem [resolvable:$true] %s176_s24 }
   0xd   : > { %p619_p8 = scmp.lt.s32.totalorder %s799_s14, 2  ;;  %s802_s25 = smov 64  }
   0xe   : > { %p607_p6 = pnand %p854_p3, %p606_p5  ;;  %s803_s26 = smov 4  }
   0xf   : > { %p620_p9 = scmp.eq.s32.totalorder %s799_s14, 0  ;;  %s201_s29 = sshll.u32 %s917_s1, 4  ;;  %s202_s29 = int_to_ptr.hbm [resolvable:$true] %s201_s29 }
  0x10   : > { %609 = dma.hbm_to_vmem [thread:$0]  (!%p607_p6), %s175_s22, 128, %s177_s24, [#allocation7], %s802_s25, %s802_s25, %s803_s26  }
  0x11   : > { %s804_s30 = smov [#allocation9]   ;;  %p611_p10 = pnand %p620_p9, %p619_p8 }
  0x12   : > { %s203_s4 = sshll.u32 %s804_s30, 4  ;;  %225 = sbr.rel (%p860_p4) target bundleno = 705 (0x2c1), region = 32  ;;  %s204_s4 = int_to_ptr.vmem [resolvable:$true] %s203_s4 }
  0x13   : > { %613 = dma.hbm_to_vmem [thread:$0]  (!%p611_p10), %s202_s29, 256, %s204_s4, [#allocation10], %s802_s25, %s802_s25, %s803_s26  }
  0x17   : > { %778 = dma.done.wait (%p854_p3), [#allocation7], 128  }
  0x18   : > { %780 = vsyncadd (%p854_p3), [#allocation7], 4294967168 }
  0x19   : > { %782 = dma.done.wait (%p854_p3), [#allocation10], 256  }
  0x1a   : > { %784 = vsyncadd (%p854_p3), [#allocation10], 4294967040  ;;  %p278_p11 = scmp.eq.s32.totalorder %s791_s12, 0 }
  0x1b   : > { %vm284_vm0 = vcmask (%p278_p11), 7168   ;;  %v805_v0 = vmov (%p278_p11), -inf   ;;  %v806_v1 = vmov (%p278_p11), 0.0  }
  0x1c   : > { %283 = sbr.rel (!%p278_p11) target bundleno = 33 (0x21), region = 44  ;;  %285 = vst.msk [vmem:[#allocation3] sm:$0xff] (%p278_p11), %vm284_vm0, %v805_v0 }
  0x1d   : > { %286 = vst.msk [vmem:[#allocation3 + $0x8] sm:$0xff] (%p278_p11), %vm284_vm0, %v805_v0 }
  0x1e   : > { %287 = vst.msk [vmem:[#allocation4] sm:$0xff] (%p278_p11), %vm284_vm0, %v806_v1 }
  0x1f   : > { %288 = vst.msk [vmem:[#allocation4 + $0x8] sm:$0xff] (%p278_p11), %vm284_vm0, %v806_v1 }
  0x21 PF: > { %p569_p12 = scmp.ne.s32.totalorder %s791_s12, 0 }
  0x23   : > { %291 = sbr.rel (%p569_p12) target bundleno = 547 (0x223), region = 48 }
  0x28   : > { %v592_v2 = vld [vmem:[#allocation9 + $0x8] sm:$0xff]  ;;  %v591_v3 = vld [vmem:[#allocation9] sm:$0xff]  ;;  %v590_v4 = vld [vmem:[#allocation6] sm:$0xff]  ;;  %vm319_vm1 = vcmask 261120   ;;  %v807_v10 = vmov 0   ;;  %vm377_vm2 = vcmask 7168  }
  0x29   : > { %329 = vmatpush.bf16.msra.mxu0 %v592_v2  ;;  %v663_v5 = vld [vmem:[%s918_s2] ss:$0 sm:$0xff]  ;;  %661 = vset.pattern.permute.xlu1 %v807_v10  ;;  %v337_v11 = vld [vmem:[#allocation3] sm:$0xff]  ;;  %v338_v15 = vld [vmem:[#allocation3 + $0x8] sm:$0xff] }
  0x2a   : > { %662 = vset.pattern.permute.xlu0 %v807_v10  ;;  %v345_v30 = vld [vmem:[#allocation4] sm:$0xff]  ;;  %v346_v35 = vld [vmem:[#allocation4 + $0x8] sm:$0xff] }
  0x2d   : > { %330 = vmatpush.bf16.msra.mxu0 %v591_v3 }
  0x30   : > { %582 = vmatmul.msk.bf16.vlgmr.msra.gmra.mxu0 %vm319_vm1, %v590_v4 }
  0xad   : > { %v332_v6 = vpop.f32.mrf.mxu0 }
  0xae   : > { %v333_v7 = vadd.f32 %v663_v5, %v332_v6 }
  0xb0   : > { %384 = vst [vmem:[#allocation2] sm:$0xff] %v333_v7  ;;  %339 = vmax.xlane.f32.xlu0 %v333_v7 }
  0xb5   : > { %v334_v8 = vpop.f32.mrf.mxu0 }
  0xb6   : > { %v335_v9 = vadd.f32 %v663_v5, %v334_v8 }
  0xb8   : > { %385 = vst [vmem:[#allocation2 + $0x8] sm:$0xff] %v335_v9  ;;  %341 = vmax.xlane.f32.xlu0 %v335_v9 }
 0x123   : > { %v340_v12 = vpop.xlane.xlu0 %339 }
 0x124   : > { %v343_v13 = vmax.f32 %v337_v11, %v340_v12 }
 0x126   : > { %v347_v14 = vsub.f32 %v337_v11, %v343_v13  ;;  %380 = vst.msk [vmem:[#allocation3] sm:$0xff] %vm377_vm2, %v343_v13  ;;  %357 = vperm.xlu1 %661, %v343_v13  }
 0x128   : > { %v349_v27 = vmul.f32 1.442695, %v347_v14 }
 0x12b   : > { %v342_v16 = vpop.xlane.xlu0 %341 }
 0x12c   : > { %v344_v17 = vmax.f32 %v338_v15, %v342_v16 }
 0x12e   : > { %v348_v18 = vsub.f32 %v338_v15, %v344_v17  ;;  %381 = vst.msk [vmem:[#allocation3 + $0x8] sm:$0xff] %vm377_vm2, %v344_v17  ;;  %362 = vperm.xlu1 %661, %v344_v17  }
 0x130   : > { %v351_v28 = vmul.f32 1.442695, %v348_v18 }
 0x198   : > { %v358_v19 = vpop.permute.xlu1 %357 }
 0x199   : > { %v365_v20 = vsub.f32 %v333_v7, %v358_v19 }
 0x19b   : > { %v367_v21 = vmul.f32 1.442695, %v365_v20 }
 0x19d   : > { %664 = vpow2.f32 %v367_v21 }
 0x1a0   : > { %v363_v22 = vpop.permute.xlu1 %362 }
 0x1a1   : > { %v366_v23 = vsub.f32 %v335_v9, %v363_v22 }
 0x1a3   : > { %v665_v24 = vpop.eup %664  ;;  %v369_v25 = vmul.f32 1.442695, %v366_v23 }
 0x1a4   : > { %371 = vadd.xlane.f32.xlu2 %v665_v24 }
 0x1a5   : > { %666 = vpow2.f32 %v369_v25 }
 0x1a6   : > { %668 = vpow2.f32 %v349_v27 }
 0x1a7   : > { %670 = vpow2.f32 %v351_v28 }
 0x1ab   : > { %v667_v26 = vpop.eup %666 }
 0x1ac   : > { %373 = vadd.xlane.f32.xlu2 %v667_v26  ;;  %v669_v29 = vpop.eup %668 }
 0x1ad   : > { %v353_v31 = vmul.f32 %v669_v29, %v345_v30  ;;  %v671_v34 = vpop.eup %670 }
 0x1ae   : > { %v354_v36 = vmul.f32 %v671_v34, %v346_v35 }
 0x217   : > { %v372_v32 = vpop.xlane.xlu2 %371 }
 0x218   : > { %v375_v33 = vadd.f32 %v372_v32, %v353_v31 }
 0x21a   : > { %378 = vst.msk [vmem:[#allocation4] sm:$0xff] %vm377_vm2, %v375_v33 }
 0x21f   : > { %v374_v37 = vpop.xlane.xlu2 %373 }
 0x220   : > { %v376_v38 = vadd.f32 %v374_v37, %v354_v36 }
 0x222   : > { %379 = vst.msk [vmem:[#allocation4 + $0x8] sm:$0xff] %vm377_vm2, %v376_v38 }
 0x223 PF: > { %p386_p13 = scmp.eq.s32.totalorder %s791_s12, 1 }
 0x224   : > { %v393_v39 = vld [vmem:[#allocation4] sm:$0xff] (%p386_p13)  ;;  %v391_v42 = vld [vmem:[#allocation3] sm:$0xff] (%p386_p13)  ;;  %v392_v45 = vld [vmem:[#allocation3 + $0x8] sm:$0xff] (%p386_p13)  ;;  %vm401_vm3 = vcmask (%p386_p13), 7168  }
 0x225   : > { %390 = sbr.rel (!%p386_p13) target bundleno = 566 (0x236), region = 52  ;;  %672 = vlog2.f32 (%p386_p13), %v393_v39 }
 0x229   : > { %v394_v40 = vld [vmem:[#allocation4 + $0x8] sm:$0xff] (%p386_p13) }
 0x22a   : > { %674 = vlog2.f32 %v394_v40 }
 0x22b   : > { %v673_v41 = vpop.eup %672 }
 0x22c   : > { %v396_v44 = vmul.f32 0.6931472, %v673_v41 }
 0x22e   : > { %v399_v47 = vadd.f32 %v396_v44, %v391_v42 }
 0x230   : > { %v675_v43 = vpop.eup %674  ;;  %402 = vst.msk [vmem:[#allocation5] sm:$0xff] %vm401_vm3, %v399_v47 }
 0x231   : > { %v398_v46 = vmul.f32 0.6931472, %v675_v43 }
 0x233   : > { %v400_v48 = vadd.f32 %v398_v46, %v392_v45 }
 0x235   : > { %403 = vst.msk [vmem:[#allocation5 + $0x8] sm:$0xff] %vm401_vm3, %v400_v48 }
 0x236 PF: > { %p584_p0 = scmp.ne.s32.totalorder %s791_s12, 1 }
 0x238   : > { %406 = sbr.rel (%p584_p0) target bundleno = 701 (0x2bd), region = 56 }
 0x23d   : > { %v411_v49 = vld [vmem:[#allocation5] sm:$0xff]  ;;  %v808_v50 = vmov 0   ;;  %v412_v51 = vld [vmem:[#allocation5 + $0x8] sm:$0xff]  ;;  %v409_v52 = vld [vmem:[#allocation2] sm:$0xff] }
 0x23e   : > { %676 = vset.pattern.permute.xlu0 %v808_v50  ;;  %v410_v55 = vld [vmem:[#allocation2 + $0x8] sm:$0xff] }
 0x23f   : > { %415 = vperm.xlu0 %676, %v411_v49  }
 0x247   : > { %420 = vperm.xlu0 %676, %v412_v51  }
 0x2b1   : > { %v416_v53 = vpop.permute.xlu0 %415 }
 0x2b2   : > { %v423_v54 = vsub.f32 %v409_v52, %v416_v53 }
 0x2b4   : > { %425 = vst [vmem:[#allocation11] sm:$0xff] %v423_v54 }
 0x2b9   : > { %v421_v56 = vpop.permute.xlu0 %420 }
 0x2ba   : > { %v424_v57 = vsub.f32 %v410_v55, %v421_v56 }
 0x2bc   : > { %426 = vst [vmem:[#allocation11 + $0x8] sm:$0xff] %v424_v57 }
 0x2bd PF: > { %p623_p1 = scmp.eq.s32.totalorder %s558_s15, 1  ;;  %s444_s9 = sshll.u32 %s919_s3, 4  ;;  %s445_s9 = int_to_ptr.hbm [resolvable:$true] %s444_s9 }
 0x2be   : > { %s809_s10 = smov [#allocation11]   ;;  %s810_s12 = smov 128  }
 0x2bf   : > { %s442_s11 = sshll.u32 %s809_s10, 4  ;;  %s811_s18 = smov 8   ;;  %s443_s11 = int_to_ptr.vmem [resolvable:$true] %s442_s11 }
 0x2c0   : > { %603 = dma.vmem_to_hbm [thread:$0]  (%p623_p1), %s443_s11, 256, %s445_s9, [#allocation8], %s810_s12, %s810_s12, %s811_s18  }
 0x2c1 PF: > { %p625_p2 = scmp.eq.s32.totalorder %s559_s16, 1 }
 0x2c3   : > { %p615_p3 = pnand %p625_p2, %p562_p7 }
 0x2c5   : > { %p616_p4 = pneg %p615_p3 }
 0x2c7   : > { %786 = dma.done.wait (%p616_p4), [#allocation8], 256  }
 0x2c8   : > { %788 = vsyncadd (%p616_p4), [#allocation8], 4294967040  ;;  %s20_s14 = sadd.s32 1, %s799_s14   ;;  %s922_s12 = smov %s795_s13 }
 0x2c9   : > { %p17_p5 = scmp.ge.s32.totalorder %s20_s14, 4   ;;  %s923_s13 = smov %s925_s17 }
 0x2cb   :  { %19 = sbr.rel (!%p17_p5) target bundleno = 6 (0x6), region = 104 }
 0x2d0   :  { %466 = vsyncpa [#allocation7], 1 }
 0x2d1   :  { %468 = vsyncpa [#allocation7 + $0x1], 1 }
 0x2d2   :  { %469 = vsyncpa [#allocation10], 1 }
 0x2d3   :  { %471 = vsyncpa [#allocation10 + $0x1], 1 }
 0x2d4   :  { %472 = vsyncpa [#allocation8], 1 }
 0x2d5   :  { %474 = vsyncpa [#allocation8 + $0x1], 1 }

</bundles_post_ra>
